<compile_context>
chip_gen: v7x
topology: tpu7x:2x2x1
jax: 0.10.0
libtpu: 0.0.40
codegen_flags: <defaults>
</compile_context>

<pallas_src>
import functools

import jax
import jax.numpy as jnp
from jax import lax
from jax.experimental import pallas as pl
from jax.experimental.pallas import tpu as pltpu

_SHIFTS = (-2, -1, 1, 2)   # 5x5 cascade window, radius 2 (d=0 handled as init)


def _round_up(v, m):
    return (v + m - 1) // m * m


def _pick_c_tile(c):
    """Largest divisor of c that is <= 128 (halo-free channel tiling)."""
    for t in (128, 64, 32, 16, 8):
        if c % t == 0:
            return t
    return c


def spp_kernel(x_ref, widx_ref, o_ref, buf_ref, *, width):
    """One (batch, channel-tile) block per grid step.

    x_ref   : (1, C_TILE, L)     input tile, L = H*W flattened (lane-dense)
    widx_ref: (1, L) int32       column index (i mod W) for the W-shift masks
    o_ref   : (1, 4, C_TILE, L)  fused output [x | pool5 | pool9 | pool13]
    buf_ref : (C_TILE, 2*S + L)  scratch: tile with an S-wide -inf halo/side
    """
    c_tile = x_ref.shape[1]
    L = x_ref.shape[2]
    S = (buf_ref.shape[1] - L) // 2
    dtype = x_ref.dtype
    if jnp.issubdtype(dtype, jnp.floating):
        pad_val = float("-inf")            # matches PyTorch max_pool2d padding
    else:
        pad_val = int(jnp.iinfo(dtype).min)

    x = x_ref[0]                           # (C_TILE, L)
    o_ref[0, 0] = x                        # identity slab of the channel concat

    # -inf halo strips (vertical 'same' padding). Only the center region is
    # ever rewritten below, so refilling just the two strips per grid step is
    # sufficient, cheap, and megacore-safe.
    buf_ref[:, 0:S] = jnp.full((c_tile, S), pad_val, dtype)
    buf_ref[:, S + L:] = jnp.full((c_tile, S), pad_val, dtype)

    # Column-validity masks for W-direction (within-row) flat shifts: lanes
    # where (i mod W) + s falls outside [0, W) would read the neighbouring row
    # and must act as -inf padding. (1, L) masks broadcast over channels;
    # computed once per grid step, reused by all 3 cascade stages.
    w_idx = widx_ref[...]
    wmask = {s: jnp.logical_and(w_idx + s >= 0, w_idx + s < width)
             for s in _SHIFTS}

    cur = x
    for stage in range(3):                 # pool5 o pool5 o pool5 = 5 / 9 / 13
        # Row (H-direction) pass: flat shifts by d*W; halo supplies padding.
        buf_ref[:, S:S + L] = cur
        r = cur                            # d = 0 term
        for d in _SHIFTS:
            off = S + d * width
            r = jnp.maximum(r, buf_ref[:, off:off + L])

        # Column (W-direction) pass: flat shifts by +-1/+-2 with column masks.
        buf_ref[:, S:S + L] = r
        out = r                            # s = 0 term
        for s in _SHIFTS:
            shifted = buf_ref[:, S + s:S + s + L]
            out = jnp.maximum(out, jnp.where(wmask[s], shifted, pad_val))

        o_ref[0, stage + 1] = out
        cur = out


def spp(x):
    """SPP forward. x: (N, C, H, W) -> (N, 4C, H, W), NCHW like PyTorch."""
    N, C, H, W = x.shape
    L = H * W
    c_tile = _pick_c_tile(C)
    S = _round_up(max(2 * W, 2), 128)      # halo >= 2 rows, lane-aligned
    itemsize = jnp.dtype(x.dtype).itemsize

    # Free reshapes: (N, C, H, W) -> (N, C, H*W); the (N, 4, C, H*W) output is
    # exactly the row-major layout of (N, 4C, H, W) in the PyTorch concat order.
    x_flat = x.reshape(N, C, L)
    w_idx = (jnp.arange(L, dtype=jnp.int32) % W).reshape(1, L)

    blk_in = c_tile * L * itemsize
    blk_out = 4 * c_tile * L * itemsize
    blk_idx = L * 4
    scratch_bytes = c_tile * (L + 2 * S) * itemsize
    vmem_needed = 2 * (blk_in + blk_out + blk_idx) + scratch_bytes
    vmem_limit = int(min(64 << 20, max(32 << 20, 2 * vmem_needed)))

    cost = pl.CostEstimate(
        flops=36 * N * C * L,                        # 3 stages * (8 max + 4 sel)
        transcendentals=0,
        bytes_accessed=5 * N * C * L * itemsize,     # 1 read + 4 writes
    )

    out = pl.pallas_call(
        functools.partial(spp_kernel, width=W),
        out_shape=jax.ShapeDtypeStruct((N, 4, C, L), x.dtype),
        grid_spec=pltpu.PrefetchScalarGridSpec(
            num_scalar_prefetch=0,
            grid=(N, C // c_tile),
            in_specs=[
                pl.BlockSpec((1, c_tile, L), lambda n, c: (n, c, 0)),
                pl.BlockSpec((1, L), lambda n, c: (0, 0)),
            ],
            out_specs=pl.BlockSpec((1, 4, c_tile, L), lambda n, c: (n, 0, c, 0)),
            scratch_shapes=[pltpu.VMEM((c_tile, L + 2 * S), x.dtype)],
        ),
        compiler_params=pltpu.CompilerParams(
            dimension_semantics=("parallel", "parallel"),
            vmem_limit_bytes=vmem_limit,
        ),
        cost_estimate=cost,
    )(x_flat, w_idx)
    return out.reshape(N, 4 * C, H, W)


def _ref_spp(x):
    """Pure-JAX reference (PyTorch max_pool2d pads with -inf)."""
    def mp(v, k):
        p = k // 2
        return lax.reduce_window(
            v, -jnp.inf, lax.max,
            window_dimensions=(1, 1, k, k),
            window_strides=(1, 1, 1, 1),
            padding=((0, 0), (0, 0), (p, p), (p, p)))
    return jnp.concatenate([x, mp(x, 5), mp(x, 9), mp(x, 13)], axis=1)


if __name__ == "__main__":
    key = jax.random.PRNGKey(0)
    N, C, H, W = 2, 4, 16, 16
    x = jax.random.normal(key, (N, C, H, W), dtype=jnp.float32)

    out = jax.block_until_ready(spp(x))
    assert out.shape == (N, 4 * C, H, W), out.shape

    ref = jax.block_until_ready(_ref_spp(x))
    assert jnp.allclose(out, ref), "Pallas SPP mismatch vs reference"

    print("KERNEL_OK")
</pallas_src>

<mosaic_0001>
module attributes {stable_mosaic.version = 11 : i64} {
  func.func @spp_kernel(%arg0: i32, %arg1: i32, %arg2: memref<1x4x256xf32, #tpu.memory_space<vmem>>, %arg3: memref<1x256xi32, #tpu.memory_space<vmem>>, %arg4: memref<1x4x4x256xf32, #tpu.memory_space<vmem>>, %arg5: memref<4x512xf32, #tpu.memory_space<vmem>>) attributes {dimension_semantics = [#tpu.dimension_semantics<parallel>, #tpu.dimension_semantics<parallel>], iteration_bounds = array<i64: 2, 1>, scalar_prefetch = 0 : i64, scratch_operands = 1 : i64, tpu.core_type = #tpu.core_type<tc>, window_params = [{transform_indices = @transform_0, window_bounds = array<i64: 1, 4, 256>}, {pipeline_mode = #tpu.pipeline_mode<synchronous>, transform_indices = @transform_1, window_bounds = array<i64: 1, 256>}, {transform_indices = @transform_2, window_bounds = array<i64: 1, 4, 4, 256>}]} {
    %c0 = arith.constant 0 : index
    %c0_0 = arith.constant 0 : index
    %c0_1 = arith.constant 0 : index
    %0 = vector.load %arg2[%c0, %c0_0, %c0_1] : memref<1x4x256xf32, #tpu.memory_space<vmem>>, vector<1x4x256xf32>
    %1 = vector.shape_cast %0 : vector<1x4x256xf32> to vector<4x256xf32>
    %c0_2 = arith.constant 0 : index
    %c0_3 = arith.constant 0 : index
    %c0_4 = arith.constant 0 : index
    %c0_5 = arith.constant 0 : index
    %2 = vector.load %arg4[%c0_2, %c0_3, %c0_4, %c0_5] : memref<1x4x4x256xf32, #tpu.memory_space<vmem>>, vector<1x1x4x256xf32>
    %3 = vector.shape_cast %2 : vector<1x1x4x256xf32> to vector<4x256xf32>
    %4 = vector.shape_cast %1 : vector<4x256xf32> to vector<1x1x4x256xf32>
    tpu.vector_store %arg4[%c0_2, %c0_3, %c0_4, %c0_5], %4 {strides = array<i32>} : memref<1x4x4x256xf32, #tpu.memory_space<vmem>>, vector<1x1x4x256xf32>,
    %cst = arith.constant 0xFF800000 : f32
    %5 = vector.broadcast %cst : f32 to vector<4x128xf32>
    %c0_6 = arith.constant 0 : index
    %c0_7 = arith.constant 0 : index
    %6 = vector.load %arg5[%c0_6, %c0_7] : memref<4x512xf32, #tpu.memory_space<vmem>>, vector<4x128xf32>
    tpu.vector_store %arg5[%c0_6, %c0_7], %5 {strides = array<i32>} : memref<4x512xf32, #tpu.memory_space<vmem>>, vector<4x128xf32>,
    %cst_8 = arith.constant 0xFF800000 : f32
    %7 = vector.broadcast %cst_8 : f32 to vector<4x128xf32>
    %c0_9 = arith.constant 0 : index
    %c384 = arith.constant 384 : index
    %8 = vector.load %arg5[%c0_9, %c384] : memref<4x512xf32, #tpu.memory_space<vmem>>, vector<4x128xf32>
    tpu.vector_store %arg5[%c0_9, %c384], %7 {strides = array<i32>} : memref<4x512xf32, #tpu.memory_space<vmem>>, vector<4x128xf32>,
    %c0_10 = arith.constant 0 : index
    %c0_11 = arith.constant 0 : index
    %9 = vector.load %arg3[%c0_10, %c0_11] : memref<1x256xi32, #tpu.memory_space<vmem>>, vector<1x256xi32>
    %c-2_i32 = arith.constant -2 : i32
    %10 = vector.broadcast %c-2_i32 : i32 to vector<1x256xi32>
    %11 = arith.addi %9, %10 : vector<1x256xi32>
    %c0_i32 = arith.constant 0 : i32
    %12 = vector.broadcast %c0_i32 : i32 to vector<1x256xi32>
    %13 = arith.cmpi sge, %11, %12 : vector<1x256xi32>
    %c-2_i32_12 = arith.constant -2 : i32
    %14 = vector.broadcast %c-2_i32_12 : i32 to vector<1x256xi32>
    %15 = arith.addi %9, %14 : vector<1x256xi32>
    %c16_i32 = arith.constant 16 : i32
    %16 = vector.broadcast %c16_i32 : i32 to vector<1x256xi32>
    %17 = arith.cmpi slt, %15, %16 : vector<1x256xi32>
    %18 = arith.andi %13, %17 : vector<1x256xi1>
    %c-1_i32 = arith.constant -1 : i32
    %19 = vector.broadcast %c-1_i32 : i32 to vector<1x256xi32>
    %20 = arith.addi %9, %19 : vector<1x256xi32>
    %c0_i32_13 = arith.constant 0 : i32
    %21 = vector.broadcast %c0_i32_13 : i32 to vector<1x256xi32>
    %22 = arith.cmpi sge, %20, %21 : vector<1x256xi32>
    %c-1_i32_14 = arith.constant -1 : i32
    %23 = vector.broadcast %c-1_i32_14 : i32 to vector<1x256xi32>
    %24 = arith.addi %9, %23 : vector<1x256xi32>
    %c16_i32_15 = arith.constant 16 : i32
    %25 = vector.broadcast %c16_i32_15 : i32 to vector<1x256xi32>
    %26 = arith.cmpi slt, %24, %25 : vector<1x256xi32>
    %27 = arith.andi %22, %26 : vector<1x256xi1>
    %c1_i32 = arith.constant 1 : i32
    %28 = vector.broadcast %c1_i32 : i32 to vector<1x256xi32>
    %29 = arith.addi %9, %28 : vector<1x256xi32>
    %c0_i32_16 = arith.constant 0 : i32
    %30 = vector.broadcast %c0_i32_16 : i32 to vector<1x256xi32>
    %31 = arith.cmpi sge, %29, %30 : vector<1x256xi32>
    %c1_i32_17 = arith.constant 1 : i32
    %32 = vector.broadcast %c1_i32_17 : i32 to vector<1x256xi32>
    %33 = arith.addi %9, %32 : vector<1x256xi32>
    %c16_i32_18 = arith.constant 16 : i32
    %34 = vector.broadcast %c16_i32_18 : i32 to vector<1x256xi32>
    %35 = arith.cmpi slt, %33, %34 : vector<1x256xi32>
    %36 = arith.andi %31, %35 : vector<1x256xi1>
    %c2_i32 = arith.constant 2 : i32
    %37 = vector.broadcast %c2_i32 : i32 to vector<1x256xi32>
    %38 = arith.addi %9, %37 : vector<1x256xi32>
    %c0_i32_19 = arith.constant 0 : i32
    %39 = vector.broadcast %c0_i32_19 : i32 to vector<1x256xi32>
    %40 = arith.cmpi sge, %38, %39 : vector<1x256xi32>
    %c2_i32_20 = arith.constant 2 : i32
    %41 = vector.broadcast %c2_i32_20 : i32 to vector<1x256xi32>
    %42 = arith.addi %9, %41 : vector<1x256xi32>
    %c16_i32_21 = arith.constant 16 : i32
    %43 = vector.broadcast %c16_i32_21 : i32 to vector<1x256xi32>
    %44 = arith.cmpi slt, %42, %43 : vector<1x256xi32>
    %45 = arith.andi %40, %44 : vector<1x256xi1>
    %c0_22 = arith.constant 0 : index
    %c128 = arith.constant 128 : index
    %46 = vector.load %arg5[%c0_22, %c128] : memref<4x512xf32, #tpu.memory_space<vmem>>, vector<4x256xf32>
    tpu.vector_store %arg5[%c0_22, %c128], %1 {strides = array<i32>} : memref<4x512xf32, #tpu.memory_space<vmem>>, vector<4x256xf32>,
    %c0_23 = arith.constant 0 : index
    %c96 = arith.constant 96 : index
    %47 = vector.load %arg5[%c0_23, %c96] : memref<4x512xf32, #tpu.memory_space<vmem>>, vector<4x256xf32>
    %48 = arith.maximumf %1, %47 : vector<4x256xf32>
    %c0_24 = arith.constant 0 : index
    %c112 = arith.constant 112 : index
    %49 = vector.load %arg5[%c0_24, %c112] : memref<4x512xf32, #tpu.memory_space<vmem>>, vector<4x256xf32>
    %50 = arith.maximumf %48, %49 : vector<4x256xf32>
    %c0_25 = arith.constant 0 : index
    %c144 = arith.constant 144 : index
    %51 = vector.load %arg5[%c0_25, %c144] : memref<4x512xf32, #tpu.memory_space<vmem>>, vector<4x256xf32>
    %52 = arith.maximumf %50, %51 : vector<4x256xf32>
    %c0_26 = arith.constant 0 : index
    %c160 = arith.constant 160 : index
    %53 = vector.load %arg5[%c0_26, %c160] : memref<4x512xf32, #tpu.memory_space<vmem>>, vector<4x256xf32>
    %54 = arith.maximumf %52, %53 : vector<4x256xf32>
    %c0_27 = arith.constant 0 : index
    %c128_28 = arith.constant 128 : index
    %55 = vector.load %arg5[%c0_27, %c128_28] : memref<4x512xf32, #tpu.memory_space<vmem>>, vector<4x256xf32>
    tpu.vector_store %arg5[%c0_27, %c128_28], %54 {strides = array<i32>} : memref<4x512xf32, #tpu.memory_space<vmem>>, vector<4x256xf32>,
    %c0_29 = arith.constant 0 : index
    %c126 = arith.constant 126 : index
    %56 = vector.load %arg5[%c0_29, %c126] : memref<4x512xf32, #tpu.memory_space<vmem>>, vector<4x256xf32>
    %cst_30 = arith.constant 0xFF800000 : f32
    %57 = vector.shape_cast %18 : vector<1x256xi1> to vector<1x256xi1>
    %58 = vector.broadcast %57 : vector<1x256xi1> to vector<4x256xi1>
    %59 = vector.broadcast %cst_30 : f32 to vector<4x256xf32>
    %60 = arith.select %58, %56, %59 : vector<4x256xi1>, vector<4x256xf32>
    %61 = arith.maximumf %54, %60 : vector<4x256xf32>
    %c0_31 = arith.constant 0 : index
    %c127 = arith.constant 127 : index
    %62 = vector.load %arg5[%c0_31, %c127] : memref<4x512xf32, #tpu.memory_space<vmem>>, vector<4x256xf32>
    %cst_32 = arith.constant 0xFF800000 : f32
    %63 = vector.shape_cast %27 : vector<1x256xi1> to vector<1x256xi1>
    %64 = vector.broadcast %63 : vector<1x256xi1> to vector<4x256xi1>
    %65 = vector.broadcast %cst_32 : f32 to vector<4x256xf32>
    %66 = arith.select %64, %62, %65 : vector<4x256xi1>, vector<4x256xf32>
    %67 = arith.maximumf %61, %66 : vector<4x256xf32>
    %c0_33 = arith.constant 0 : index
    %c129 = arith.constant 129 : index
    %68 = vector.load %arg5[%c0_33, %c129] : memref<4x512xf32, #tpu.memory_space<vmem>>, vector<4x256xf32>
    %cst_34 = arith.constant 0xFF800000 : f32
    %69 = vector.shape_cast %36 : vector<1x256xi1> to vector<1x256xi1>
    %70 = vector.broadcast %69 : vector<1x256xi1> to vector<4x256xi1>
    %71 = vector.broadcast %cst_34 : f32 to vector<4x256xf32>
    %72 = arith.select %70, %68, %71 : vector<4x256xi1>, vector<4x256xf32>
    %73 = arith.maximumf %67, %72 : vector<4x256xf32>
    %c0_35 = arith.constant 0 : index
    %c130 = arith.constant 130 : index
    %74 = vector.load %arg5[%c0_35, %c130] : memref<4x512xf32, #tpu.memory_space<vmem>>, vector<4x256xf32>
    %cst_36 = arith.constant 0xFF800000 : f32
    %75 = vector.shape_cast %45 : vector<1x256xi1> to vector<1x256xi1>
    %76 = vector.broadcast %75 : vector<1x256xi1> to vector<4x256xi1>
    %77 = vector.broadcast %cst_36 : f32 to vector<4x256xf32>
    %78 = arith.select %76, %74, %77 : vector<4x256xi1>, vector<4x256xf32>
    %79 = arith.maximumf %73, %78 : vector<4x256xf32>
    %c0_37 = arith.constant 0 : index
    %c1 = arith.constant 1 : index
    %c0_38 = arith.constant 0 : index
    %c0_39 = arith.constant 0 : index
    %80 = vector.load %arg4[%c0_37, %c1, %c0_38, %c0_39] : memref<1x4x4x256xf32, #tpu.memory_space<vmem>>, vector<1x1x4x256xf32>
    %81 = vector.shape_cast %80 : vector<1x1x4x256xf32> to vector<4x256xf32>
    %82 = vector.shape_cast %79 : vector<4x256xf32> to vector<1x1x4x256xf32>
    tpu.vector_store %arg4[%c0_37, %c1, %c0_38, %c0_39], %82 {strides = array<i32>} : memref<1x4x4x256xf32, #tpu.memory_space<vmem>>, vector<1x1x4x256xf32>,
    %c0_40 = arith.constant 0 : index
    %c128_41 = arith.constant 128 : index
    %83 = vector.load %arg5[%c0_40, %c128_41] : memref<4x512xf32, #tpu.memory_space<vmem>>, vector<4x256xf32>
    tpu.vector_store %arg5[%c0_40, %c128_41], %79 {strides = array<i32>} : memref<4x512xf32, #tpu.memory_space<vmem>>, vector<4x256xf32>,
    %c0_42 = arith.constant 0 : index
    %c96_43 = arith.constant 96 : index
    %84 = vector.load %arg5[%c0_42, %c96_43] : memref<4x512xf32, #tpu.memory_space<vmem>>, vector<4x256xf32>
    %85 = arith.maximumf %79, %84 : vector<4x256xf32>
    %c0_44 = arith.constant 0 : index
    %c112_45 = arith.constant 112 : index
    %86 = vector.load %arg5[%c0_44, %c112_45] : memref<4x512xf32, #tpu.memory_space<vmem>>, vector<4x256xf32>
    %87 = arith.maximumf %85, %86 : vector<4x256xf32>
    %c0_46 = arith.constant 0 : index
    %c144_47 = arith.constant 144 : index
    %88 = vector.load %arg5[%c0_46, %c144_47] : memref<4x512xf32, #tpu.memory_space<vmem>>, vector<4x256xf32>
    %89 = arith.maximumf %87, %88 : vector<4x256xf32>
    %c0_48 = arith.constant 0 : index
    %c160_49 = arith.constant 160 : index
    %90 = vector.load %arg5[%c0_48, %c160_49] : memref<4x512xf32, #tpu.memory_space<vmem>>, vector<4x256xf32>
    %91 = arith.maximumf %89, %90 : vector<4x256xf32>
    %c0_50 = arith.constant 0 : index
    %c128_51 = arith.constant 128 : index
    %92 = vector.load %arg5[%c0_50, %c128_51] : memref<4x512xf32, #tpu.memory_space<vmem>>, vector<4x256xf32>
    tpu.vector_store %arg5[%c0_50, %c128_51], %91 {strides = array<i32>} : memref<4x512xf32, #tpu.memory_space<vmem>>, vector<4x256xf32>,
    %c0_52 = arith.constant 0 : index
    %c126_53 = arith.constant 126 : index
    %93 = vector.load %arg5[%c0_52, %c126_53] : memref<4x512xf32, #tpu.memory_space<vmem>>, vector<4x256xf32>
    %cst_54 = arith.constant 0xFF800000 : f32
    %94 = vector.shape_cast %18 : vector<1x256xi1> to vector<1x256xi1>
    %95 = vector.broadcast %94 : vector<1x256xi1> to vector<4x256xi1>
    %96 = vector.broadcast %cst_54 : f32 to vector<4x256xf32>
    %97 = arith.select %95, %93, %96 : vector<4x256xi1>, vector<4x256xf32>
    %98 = arith.maximumf %91, %97 : vector<4x256xf32>
    %c0_55 = arith.constant 0 : index
    %c127_56 = arith.constant 127 : index
    %99 = vector.load %arg5[%c0_55, %c127_56] : memref<4x512xf32, #tpu.memory_space<vmem>>, vector<4x256xf32>
    %cst_57 = arith.constant 0xFF800000 : f32
    %100 = vector.shape_cast %27 : vector<1x256xi1> to vector<1x256xi1>
    %101 = vector.broadcast %100 : vector<1x256xi1> to vector<4x256xi1>
    %102 = vector.broadcast %cst_57 : f32 to vector<4x256xf32>
    %103 = arith.select %101, %99, %102 : vector<4x256xi1>, vector<4x256xf32>
    %104 = arith.maximumf %98, %103 : vector<4x256xf32>
    %c0_58 = arith.constant 0 : index
    %c129_59 = arith.constant 129 : index
    %105 = vector.load %arg5[%c0_58, %c129_59] : memref<4x512xf32, #tpu.memory_space<vmem>>, vector<4x256xf32>
    %cst_60 = arith.constant 0xFF800000 : f32
    %106 = vector.shape_cast %36 : vector<1x256xi1> to vector<1x256xi1>
    %107 = vector.broadcast %106 : vector<1x256xi1> to vector<4x256xi1>
    %108 = vector.broadcast %cst_60 : f32 to vector<4x256xf32>
    %109 = arith.select %107, %105, %108 : vector<4x256xi1>, vector<4x256xf32>
    %110 = arith.maximumf %104, %109 : vector<4x256xf32>
    %c0_61 = arith.constant 0 : index
    %c130_62 = arith.constant 130 : index
    %111 = vector.load %arg5[%c0_61, %c130_62] : memref<4x512xf32, #tpu.memory_space<vmem>>, vector<4x256xf32>
    %cst_63 = arith.constant 0xFF800000 : f32
    %112 = vector.shape_cast %45 : vector<1x256xi1> to vector<1x256xi1>
    %113 = vector.broadcast %112 : vector<1x256xi1> to vector<4x256xi1>
    %114 = vector.broadcast %cst_63 : f32 to vector<4x256xf32>
    %115 = arith.select %113, %111, %114 : vector<4x256xi1>, vector<4x256xf32>
    %116 = arith.maximumf %110, %115 : vector<4x256xf32>
    %c0_64 = arith.constant 0 : index
    %c2 = arith.constant 2 : index
    %c0_65 = arith.constant 0 : index
    %c0_66 = arith.constant 0 : index
    %117 = vector.load %arg4[%c0_64, %c2, %c0_65, %c0_66] : memref<1x4x4x256xf32, #tpu.memory_space<vmem>>, vector<1x1x4x256xf32>
    %118 = vector.shape_cast %117 : vector<1x1x4x256xf32> to vector<4x256xf32>
    %119 = vector.shape_cast %116 : vector<4x256xf32> to vector<1x1x4x256xf32>
    tpu.vector_store %arg4[%c0_64, %c2, %c0_65, %c0_66], %119 {strides = array<i32>} : memref<1x4x4x256xf32, #tpu.memory_space<vmem>>, vector<1x1x4x256xf32>,
    %c0_67 = arith.constant 0 : index
    %c128_68 = arith.constant 128 : index
    %120 = vector.load %arg5[%c0_67, %c128_68] : memref<4x512xf32, #tpu.memory_space<vmem>>, vector<4x256xf32>
    tpu.vector_store %arg5[%c0_67, %c128_68], %116 {strides = array<i32>} : memref<4x512xf32, #tpu.memory_space<vmem>>, vector<4x256xf32>,
    %c0_69 = arith.constant 0 : index
    %c96_70 = arith.constant 96 : index
    %121 = vector.load %arg5[%c0_69, %c96_70] : memref<4x512xf32, #tpu.memory_space<vmem>>, vector<4x256xf32>
    %122 = arith.maximumf %116, %121 : vector<4x256xf32>
    %c0_71 = arith.constant 0 : index
    %c112_72 = arith.constant 112 : index
    %123 = vector.load %arg5[%c0_71, %c112_72] : memref<4x512xf32, #tpu.memory_space<vmem>>, vector<4x256xf32>
    %124 = arith.maximumf %122, %123 : vector<4x256xf32>
    %c0_73 = arith.constant 0 : index
    %c144_74 = arith.constant 144 : index
    %125 = vector.load %arg5[%c0_73, %c144_74] : memref<4x512xf32, #tpu.memory_space<vmem>>, vector<4x256xf32>
    %126 = arith.maximumf %124, %125 : vector<4x256xf32>
    %c0_75 = arith.constant 0 : index
    %c160_76 = arith.constant 160 : index
    %127 = vector.load %arg5[%c0_75, %c160_76] : memref<4x512xf32, #tpu.memory_space<vmem>>, vector<4x256xf32>
    %128 = arith.maximumf %126, %127 : vector<4x256xf32>
    %c0_77 = arith.constant 0 : index
    %c128_78 = arith.constant 128 : index
    %129 = vector.load %arg5[%c0_77, %c128_78] : memref<4x512xf32, #tpu.memory_space<vmem>>, vector<4x256xf32>
    tpu.vector_store %arg5[%c0_77, %c128_78], %128 {strides = array<i32>} : memref<4x512xf32, #tpu.memory_space<vmem>>, vector<4x256xf32>,
    %c0_79 = arith.constant 0 : index
    %c126_80 = arith.constant 126 : index
    %130 = vector.load %arg5[%c0_79, %c126_80] : memref<4x512xf32, #tpu.memory_space<vmem>>, vector<4x256xf32>
    %cst_81 = arith.constant 0xFF800000 : f32
    %131 = vector.shape_cast %18 : vector<1x256xi1> to vector<1x256xi1>
    %132 = vector.broadcast %131 : vector<1x256xi1> to vector<4x256xi1>
    %133 = vector.broadcast %cst_81 : f32 to vector<4x256xf32>
    %134 = arith.select %132, %130, %133 : vector<4x256xi1>, vector<4x256xf32>
    %135 = arith.maximumf %128, %134 : vector<4x256xf32>
    %c0_82 = arith.constant 0 : index
    %c127_83 = arith.constant 127 : index
    %136 = vector.load %arg5[%c0_82, %c127_83] : memref<4x512xf32, #tpu.memory_space<vmem>>, vector<4x256xf32>
    %cst_84 = arith.constant 0xFF800000 : f32
    %137 = vector.shape_cast %27 : vector<1x256xi1> to vector<1x256xi1>
    %138 = vector.broadcast %137 : vector<1x256xi1> to vector<4x256xi1>
    %139 = vector.broadcast %cst_84 : f32 to vector<4x256xf32>
    %140 = arith.select %138, %136, %139 : vector<4x256xi1>, vector<4x256xf32>
    %141 = arith.maximumf %135, %140 : vector<4x256xf32>
    %c0_85 = arith.constant 0 : index
    %c129_86 = arith.constant 129 : index
    %142 = vector.load %arg5[%c0_85, %c129_86] : memref<4x512xf32, #tpu.memory_space<vmem>>, vector<4x256xf32>
    %cst_87 = arith.constant 0xFF800000 : f32
    %143 = vector.shape_cast %36 : vector<1x256xi1> to vector<1x256xi1>
    %144 = vector.broadcast %143 : vector<1x256xi1> to vector<4x256xi1>
    %145 = vector.broadcast %cst_87 : f32 to vector<4x256xf32>
    %146 = arith.select %144, %142, %145 : vector<4x256xi1>, vector<4x256xf32>
    %147 = arith.maximumf %141, %146 : vector<4x256xf32>
    %c0_88 = arith.constant 0 : index
    %c130_89 = arith.constant 130 : index
    %148 = vector.load %arg5[%c0_88, %c130_89] : memref<4x512xf32, #tpu.memory_space<vmem>>, vector<4x256xf32>
    %cst_90 = arith.constant 0xFF800000 : f32
    %149 = vector.shape_cast %45 : vector<1x256xi1> to vector<1x256xi1>
    %150 = vector.broadcast %149 : vector<1x256xi1> to vector<4x256xi1>
    %151 = vector.broadcast %cst_90 : f32 to vector<4x256xf32>
    %152 = arith.select %150, %148, %151 : vector<4x256xi1>, vector<4x256xf32>
    %153 = arith.maximumf %147, %152 : vector<4x256xf32>
    %c0_91 = arith.constant 0 : index
    %c3 = arith.constant 3 : index
    %c0_92 = arith.constant 0 : index
    %c0_93 = arith.constant 0 : index
    %154 = vector.load %arg4[%c0_91, %c3, %c0_92, %c0_93] : memref<1x4x4x256xf32, #tpu.memory_space<vmem>>, vector<1x1x4x256xf32>
    %155 = vector.shape_cast %154 : vector<1x1x4x256xf32> to vector<4x256xf32>
    %156 = vector.shape_cast %153 : vector<4x256xf32> to vector<1x1x4x256xf32>
    tpu.vector_store %arg4[%c0_91, %c3, %c0_92, %c0_93], %156 {strides = array<i32>} : memref<1x4x4x256xf32, #tpu.memory_space<vmem>>, vector<1x1x4x256xf32>,
    return
  }
  func.func @transform_0(%arg0: i32, %arg1: i32) -> (i32, i32, i32) {
    %c0_i32 = arith.constant 0 : i32
    %c0_i32_0 = arith.constant 0 : i32
    return %arg0, %arg1, %c0_i32 : i32, i32, i32
  }
  func.func @transform_1(%arg0: i32, %arg1: i32) -> (i32, i32) {
    %c0_i32 = arith.constant 0 : i32
    %c0_i32_0 = arith.constant 0 : i32
    %c0_i32_1 = arith.constant 0 : i32
    return %c0_i32, %c0_i32_0 : i32, i32
  }
  func.func @transform_2(%arg0: i32, %arg1: i32) -> (i32, i32, i32, i32) {
    %c0_i32 = arith.constant 0 : i32
    %c0_i32_0 = arith.constant 0 : i32
    %c0_i32_1 = arith.constant 0 : i32
    return %arg0, %c0_i32, %arg1, %c0_i32_0 : i32, i32, i32, i32
  }
}

</mosaic_0001>

<bundles_post_ra>
// kernel: tpu_custom_call.1
= control target key start
LH: loop header
LB: loop body
LE: loop exit
PB: predicated region body
PF: predicated region fallthrough
CT: control target
= control target key end

     0   :  { %7 = vsyncpa [#allocation4], 0  ;;  %s1380_s0 = inlined_call_operand.hbm [shape: f32[2,4,256], index: 0, kind: input, shape index: {}]   ;;  %s1381_s1 = inlined_call_operand.vmem [shape: s32[1,256], index: 1, kind: input, shape index: {}]   ;;  %s1382_s2 = inlined_call_operand.hbm [shape: f32[2,4,4,256], index: 2, kind: output, shape index: {}]  }
   0x1   :  { %9 = vsyncpa [#allocation4 + $0x1], 0 }
   0x2   :  { %10 = vsyncpa [#allocation5], 0 }
   0x3   :  { %12 = vsyncpa [#allocation5 + $0x1], 0  ;;  %s985_s9 = smov 0   ;;  %s987_s10 = smov 0  }
   0x4   :  { %s989_s11 = smov 0   ;;  %s991_s12 = smov 0  }
   0x5   :  { %s993_s13 = smov 0   ;;  %s995_s14 = smov 0  }
   0x6 LB: > { %s745_s15 = sadd.s32 4294967295, %s954_s14   ;;  %s746_s16 = sadd.s32 4294967294, %s954_s14   ;;  %s954_s14 = sphi %s995_s14, %s18_s14   ;;  %s950_s13 = sphi %s993_s13, %s1425_s13   ;;  %s946_s12 = sphi %s991_s12, %s1424_s12   ;;  %s942_s11 = sphi %s989_s11, %s1423_s11   ;;  %s938_s10 = sphi %s987_s10, %s1422_s10   ;;  %s934_s9 = sphi %s985_s9, %s1421_s9  }
   0x7   : > { %s30_s17 = sadd.s32 1, %s950_s13  ;;  %s39_s18 = sadd.s32 1, %s942_s11 }
   0x8   : > { %p32_p0 = scmp.ge.s32.totalorder %s30_s17, 2  ;;  %p46_p1 = scmp.ne.s32.totalorder %s942_s11, %s938_s10 }
   0x9   : > { %p47_p2 = scmp.eq.s32.totalorder %s954_s14, 0  ;;  %p52_p3 = scmp.ne.s32.totalorder %s938_s10, %s934_s9 }
   0xa   : > { %s1427_s17 = smov (%p32_p0, %s30_s17), 0  ;;  %p53_p5 = scmp.eq.s32.totalorder %s745_s15, 0 }
   0xb   : > { %p1026_p4 = por %p47_p2, %p46_p1  ;;  %s34_s20 = ssub.s32 %s950_s13, %s1427_s17 }
   0xc   : > { %p99_p6 = scmp.eq.s32.totalorder %s745_s15, 1  ;;  %p37_p7 = scmp.eq.s32.totalorder %s34_s20, 0 }
   0xd   : > { %p1032_p8 = por %p53_p5, %p52_p3  ;;  %p105_p10 = scmp.eq.s32.totalorder %s746_s16, 1 }
   0xe   : > { %p1036_p9 = por %p99_p6, %p46_p1  ;;  %p777_p13 = scmp.lt.s32.totalorder %s954_s14, 2 }
   0xf   : > { %s1041_s23 = scalar_select %p37_p7, %s942_s11, %s39_s18  }
  0x10   : > { %s1389_s22 = scalar_select %p1036_p9, 1, 0 }
  0x11   : > { %p1043_p11 = por %p105_p10, %p52_p3  ;;  %s128_s25 = sand.u32 1, %s942_s11  }
  0x12   : > { %s749_s26 = sshll.u32 %s128_s25, 3  ;;  %s763_s27 = sshll.u32 %s950_s13, 7 }
  0x13   : > { %s1390_s24 = scalar_select %p1043_p11, 1, 0 }
  0x14   : > { %s1054_s30 = scalar_lea.hbm %s1380_s0, %s763_s27  ;;  %s132_s3 = scalar_lea.vmem [#allocation3], %s749_s26 }
  0x15   : > { %s142_s4 = sshll.u32 %s132_s3, 4  ;;  %p1060_p0 = pnand %p777_p13, %p1026_p4  ;;  %s1056_s4 = int_to_ptr.vmem [resolvable:$true] %s142_s4 }
  0x16   : > { %s129_s6 = scalar_lea.sflag [#allocation4], %s128_s25  ;;  %s842_s7 = scalar_lea.hbm %s1054_s30, 128 }
  0x17   : > { %p843_p3 = scmp.ne.s32.totalorder %s1054_s30, %s842_s7  ;;  %p844_p5 = pneg %p1060_p0 }
  0x18   : > { %s847_s16 = scalar_lea.hbm %s1380_s0, 256  ;;  %p848_p4 = scmp.lt.u32.totalorder %s1054_s30, %s1380_s0 }
  0x19   : > { %p845_p6 = pnand %p844_p5, %p843_p3  ;;  %p849_p10 = scmp.lt.u32.totalorder %s847_s16, %s842_s7 }
  0x1a   : > { %p851_p12 = scmp.lt.u32.totalorder %s842_s7, %s1054_s30 }
  0x1b   : > { %p846_p7 = pneg %p845_p6  ;;  %p850_p13 = por %p849_p10, %p848_p4 }
  0x1d   : > { %p852_p1 = por %p851_p12, %p850_p13 }
  0x1f   : > { %p853_p2 = pnand %p852_p1, %p846_p7 }
  0x21   : > { %856 = shalt.err (!%p853_p2)
}
  0x22   : > { %s857_s20 = scalar_lea.vmem %s1056_s4, 128  ;;  %s956_s25 = smov [#allocation3]  }
  0x23   : > { %p858_p3 = scmp.ne.s32.totalorder %s1056_s4, %s857_s20  ;;  %s862_s26 = sshll.u32 %s956_s25, 4  ;;  %s863_s26 = int_to_ptr.vmem [resolvable:$false] %s862_s26 }
  0x24   : > { %s864_s27 = scalar_lea.vmem %s863_s26, 256  ;;  %p865_p9 = scmp.lt.s32.totalorder %s1056_s4, %s863_s26 }
  0x25   : > { %p860_p6 = pnand %p858_p3, %p844_p5  ;;  %p866_p4 = scmp.lt.s32.totalorder %s864_s27, %s857_s20 }
  0x27   : > { %p861_p11 = pneg %p860_p6  ;;  %p867_p10 = por %p866_p4, %p865_p9 }
  0x29   : > { %p868_p12 = pnand %p867_p10, %p861_p11 }
  0x2b   : > { %871 = shalt.err (!%p868_p12)
}
  0x2c   : > { %772 = dma.hbm_to_vmem [thread:$0]  (!%p1060_p0), %s1054_s30, 128, %s1056_s4, %s129_s6  }
  0x2d   : > { %p1392_p1 = scmp.lt.s32.totalorder %s954_s14, 3  ;;  %p1393_p2 = scmp.ge.s32.totalorder %s954_s14, 1 }
  0x2f   : > { %p148_p5 = pnand %p1393_p2, %p1392_p1 }
  0x30   : > { %s1096_s28 = sand.u32 (!%p148_p5), 1, %s938_s10  }
  0x31   : > { %151 = sbr.rel (%p148_p5) target bundleno = 944 (0x3b0), region = 28  ;;  %s753_s29 = sshll.u32 (!%p148_p5), %s1096_s28, 3 }
  0x32   : > { %s154_s3 = scalar_lea.sflag (!%p148_p5), [#allocation4], %s1096_s28  ;;  %s157_s7 = scalar_lea.vmem (!%p148_p5), [#allocation3], %s753_s29 }
  0x38   : > { %925 = dma.done.wait (%p1032_p8), %s154_s3, 128  }
  0x39   : > { %927 = vsyncadd (%p1032_p8), %s154_s3, 4294967168  ;;  %v957_v0 = vmov -inf   ;;  %v1104_v1 = vld [vmem:[%s157_s7] sm:$0xff]  ;;  %s958_s30 = smov 112   ;;  %s959_s4 = smov 16   ;;  %vm210_vm0 = vcmask 1043456   ;;  %v257_v42 = vlaneseq }
  0x3a   : > { %181 = vst [vmem:[#allocation2 + $0xc] sm:$0xf] %v957_v0  ;;  %180 = vst [vmem:[#allocation2] sm:$0xf] %v957_v0  ;;  %s960_s5 = smov 32   ;;  %s961_s21 = smov 96  }
  0x3b   : > { %199 = vst [vmem:[#allocation2 + $0x4] sm:$0xff] %v1104_v1  ;;  %s962_s6 = smov 127   ;;  %vm212_vm1 = vcmask 261120   ;;  %vm223_vm2 = vcmask 130048   ;;  %vm238_vm3 = vcmask 916480   ;;  %vm1384_vm4 = vcmask 785408  }
  0x3c   : > { %s963_s8 = smov 1   ;;  %s964_s15 = smov 2   ;;  %v182_v39 = vld [vmem:[%s1381_s1] sm:$0x3]  ;;  %v258_v44 = vshrl.u32 %v257_v42, 7  ;;  %v966_v51 = vmov 0  }
  0x3d   : > { %s754_s16 = sshll.u32 %s1096_s28, 5  ;;  %s965_s18 = smov 126   ;;  %v183_v40 = vadd.s32 4294967294, %v182_v39  ;;  %v187_v43 = vadd.s32 4294967295, %v182_v39  ;;  %v191_v45 = vadd.s32 1, %v182_v39  ;;  %v195_v46 = vadd.s32 2, %v182_v39 }
  0x3e   : > { %s1139_s19 = scalar_lea.vmem [#allocation6], %s754_s16  ;;  %v259_v49 = vsub.s32 0, %v258_v44  ;;  %v263_v50 = vsub.s32 1, %v258_v44  ;;  %s764_s27 = sshll.u32 %s946_s12, 9 }
  0x3f   : > { %179 = vst [vmem:[%s1139_s19] sm:$0xff] %v1104_v1  ;;  %vm184_vm5 = vcmp.ge.s32.totalorder %v183_v40, 0  ;;  %vm185_vm6 = vcmp.lt.s32.totalorder %v183_v40, 16  ;;  %vm188_vm7 = vcmp.ge.s32.totalorder %v187_v43, 0  ;;  %vm189_vm8 = vcmp.lt.s32.totalorder %v187_v43, 16  ;;  %s658_s26 = sshll.u32 %s1139_s19, 4  ;;  %s1330_s7 = scalar_lea.hbm %s1382_s2, %s764_s27  ;;  %s1325_s26 = int_to_ptr.vmem [resolvable:$true] %s658_s26 }
  0x40   : > { %vm186_vm9 = vmand %vm184_vm5, %vm185_vm6  ;;  %vm192_vm11 = vcmp.ge.s32.totalorder %v191_v45, 0  ;;  %vm193_vm12 = vcmp.lt.s32.totalorder %v191_v45, 16  ;;  %vm196_vm13 = vcmp.ge.s32.totalorder %v195_v46, 0  ;;  %vm197_vm14 = vcmp.lt.s32.totalorder %v195_v46, 16  ;;  %s643_s12 = scalar_lea.sflag [#allocation5], %s1096_s28  ;;  %p1418_p9 = scmp.ne.s32.totalorder %s1389_s22, 0 }
  0x41   : > { %v228_v2 = vld [vmem:[#allocation2 + $0xc] sm:$0xf]  ;;  %vm190_vm10 = vmand %vm188_vm7, %vm189_vm8  ;;  %v256_v52 = vsel %vm186_vm9, 1, %v966_v51  ;;  %vm276_vm7 = vcmask 15360   ;;  %vm1386_vm8 = vcmask 7168  }
  0x42   : > { %233 = vrot.lane.b32.xlu1 %v228_v2, %s958_s30  ;;  %v200_v3 = vld [vmem:[#allocation2] sm:$0xff]  ;;  %v201_v4 = vld [vmem:[#allocation2 + $0x8] sm:$0xf]  ;;  %v318_v5 = vld [vmem:[#allocation2 + $0xc] sm:$0xf]  ;;  %v288_v55 = vsel %vm190_vm10, 1, %v966_v51  ;;  %v260_v56 = vrot.slane %v256_v52, %v259_v49  ;;  %v264_v57 = vrot.slane %v256_v52, %v263_v50 }
  0x43   : > { %204 = vrot.lane.b32.xlu0 %v200_v3, %s960_s5  ;;  %v1150_v38 = vld [vmem:[#allocation2 + $0xc] sm:$0xf]  ;;  %vm194_vm15 = vmand %vm192_vm11, %vm193_vm12  ;;  %v292_v58 = vrot.slane %v288_v55, %v259_v49  ;;  %v296_v59 = vrot.slane %v288_v55, %v263_v50 }
  0x44   : > { %v319_v62 = vsel %vm194_vm15, 1, %v966_v51  ;;  %vm1159_vm5 = vcmp.eq.s32.totalorder %v260_v56, 1  ;;  %vm1163_vm6 = vcmp.eq.s32.totalorder %v264_v57, 1  ;;  %v472_v44 = vld [vmem:[#allocation2 + $0xc] sm:$0xf] }
  0x45   : > { %vm1167_vm9 = vcmp.eq.s32.totalorder %v292_v58, 1  ;;  %vm1171_vm10 = vcmp.eq.s32.totalorder %v296_v59, 1 }
  0x46   : > { %216 = vrot.lane.b32.xlu1 %v200_v3, %s959_s4 }
  0x47   : > { %206 = vrot.lane.b32.xlu0 %v201_v4, %s960_s5 }
  0x4a   : > { %218 = vrot.lane.b32.xlu1 %v201_v4, %s959_s4  ;;  %v323_v4 = vrot.slane %v319_v62, %v259_v49 }
  0x4b   : > { %231 = vrot.lane.b32.xlu0 %v1104_v1, %s958_s30 }
  0x4c   : > { %vm1187_vm11 = vcmp.eq.s32.totalorder %v323_v4, 1 }
  0x4e   : > { %244 = vrot.lane.b32.xlu1 %v228_v2, %s961_s21 }
  0x4f   : > { %242 = vrot.lane.b32.xlu0 %v1104_v1, %s961_s21 }
  0x53   : > { %337 = vrot.lane.b32.xlu0 %v318_v5, %s962_s6 }
  0xb4   : > { %v234_v6 = vpop.permute.xlu1 %233 }
  0xb5   : > { %v205_v8 = vpop.permute.xlu0 %204  ;;  %v236_v20 = vrot.slane %v234_v6, 4 }
  0xb6   : > { %v208_v12 = vrot.slane %v205_v8, 4 }
  0xb8   : > { %v217_v7 = vpop.permute.xlu1 %216 }
  0xb9   : > { %v220_v9 = vrot.slane %v217_v7, 4  ;;  %v207_v11 = vpop.permute.xlu0 %206 }
  0xba   : > { %v209_v14 = vrot.slane %v207_v11, 4 }
  0xbc   : > { %v219_v10 = vpop.permute.xlu1 %218  ;;  %v211_v16 = vsel %vm210_vm0, %v208_v12, %v209_v14 }
  0xbd   : > { %v221_v13 = vrot.slane %v219_v10, 4  ;;  %v213_v17 = vsel %vm212_vm1, %v205_v8, %v211_v16  ;;  %v232_v18 = vpop.permute.xlu0 %231 }
  0xbe   : > { %v215_v21 = vmax.f32 %v1104_v1, %v213_v17  ;;  %v235_v22 = vrot.slane %v232_v18, 4 }
  0xbf   : > { %v222_v15 = vsel %vm210_vm0, %v220_v9, %v221_v13 }
  0xc0   : > { %v245_v19 = vpop.permute.xlu1 %244  ;;  %v224_v23 = vsel %vm223_vm2, %v217_v7, %v222_v15  ;;  %v237_v25 = vsel %vm210_vm0, %v235_v22, %v236_v20 }
  0xc1   : > { %v226_v24 = vmax.f32 %v215_v21, %v224_v23  ;;  %v247_v26 = vrot.slane %v245_v19, 4  ;;  %v239_v27 = vsel %vm238_vm3, %v232_v18, %v237_v25  ;;  %v243_v28 = vpop.permute.xlu0 %242 }
  0xc2   : > { %v246_v29 = vrot.slane %v243_v28, 4 }
  0xc3   : > { %v241_v30 = vmax.f32 %v226_v24, %v239_v27 }
  0xc4   : > { %v248_v31 = vsel %vm210_vm0, %v246_v29, %v247_v26 }
  0xc5   : > { %v250_v32 = vsel %vm1384_vm4, %v243_v28, %v248_v31  ;;  %v1157_v41 = vpop.permute.xlu0 %337  ;;  %vm198_vm4 = vmand %vm196_vm13, %vm197_vm14  ;;  %vm1385_vm13 = vcmask 1031168  }
  0xc6   : > { %v1127_v33 = vmax.f32 %v241_v30, %v250_v32  ;;  %v351_v63 = vsel %vm198_vm4, 1, %v966_v51  ;;  %vm339_vm4 = vcmask 1039360  }
  0xc7   : > { %v355_v8 = vrot.slane %v351_v63, %v259_v49  ;;  %v359_v20 = vrot.slane %v351_v63, %v263_v50 }
  0xc8   : > { %253 = vst [vmem:[#allocation2 + $0x4] sm:$0xff] %v1127_v33  ;;  %v332_v37 = vcombine.high %v1127_v33, %v1127_v33 }
  0xc9   : > { %vm1203_vm14 = vcmp.eq.s32.totalorder %v355_v8, 1  ;;  %vm1208_vm15 = vcmp.eq.s32.totalorder %v359_v20, 1 }
  0xcf   : > { %v254_v34 = vld [vmem:[#allocation2] sm:$0xff]  ;;  %v255_v35 = vld [vmem:[#allocation2 + $0x8] sm:$0xf] }
  0xd0   : > { %299 = vrot.lane.b32.xlu1 %v254_v34, %s963_s8  ;;  %270 = vrot.lane.b32.xlu0 %v254_v34, %s964_s15  ;;  %v269_v36 = vcombine.high %v254_v34, %v254_v34 }
  0xd4   : > { %303 = vrot.lane.b32.xlu1 %v255_v35, %s963_s8  ;;  %274 = vrot.lane.b32.xlu0 %v255_v35, %s964_s15 }
  0xd8   : > { %362 = vrot.lane.b32.xlu1 %v1127_v33, %s965_s18  ;;  %333 = vrot.lane.b32.xlu0 %v1127_v33, %s962_s6 }
  0xdc   : > { %301 = vrot.lane.b32.xlu0 %v269_v36, %s963_s8  ;;  %272 = vrot.lane.b32.xlu1 %v269_v36, %s964_s15 }
  0xe0   : > { %364 = vrot.lane.b32.xlu0 %v332_v37, %s965_s18  ;;  %335 = vrot.lane.b32.xlu1 %v332_v37, %s962_s6 }
  0xe4   : > { %366 = vrot.lane.b32.xlu1 %v318_v5, %s965_s18  ;;  %v327_v5 = vrot.slane %v319_v62, %v263_v50 }
  0xe6   : > { %vm1191_vm12 = vcmp.eq.s32.totalorder %v327_v5, 1 }
  0xe8   : > { %413 = vrot.lane.b32.xlu1 %v1150_v38, %s958_s30 }
 0x142   : > { %v300_v47 = vpop.permute.xlu1 %299  ;;  %v271_v48 = vpop.permute.xlu0 %270 }
 0x146   : > { %v304_v53 = vpop.permute.xlu1 %303  ;;  %v275_v54 = vpop.permute.xlu0 %274 }
 0x14a   : > { %v363_v60 = vpop.permute.xlu1 %362  ;;  %v334_v61 = vpop.permute.xlu0 %333 }
 0x14e   : > { %v273_v6 = vpop.permute.xlu1 %272  ;;  %v302_v7 = vpop.permute.xlu0 %301 }
 0x14f   : > { %v277_v9 = vsel %vm276_vm7, %v271_v48, %v273_v6  ;;  %v278_v10 = vsel %vm276_vm7, %v273_v6, %v275_v54  ;;  %v306_v11 = vsel %vm1386_vm8, %v300_v47, %v302_v7  ;;  %v307_v12 = vsel %vm1386_vm8, %v302_v7, %v304_v53 }
 0x150   : > { %v281_v13 = vsel %vm1159_vm5, %v277_v9, -inf  ;;  %v282_v14 = vsel %vm1163_vm6, %v278_v10, -inf  ;;  %v310_v15 = vsel %vm1167_vm9, %v306_v11, -inf  ;;  %v311_v16 = vsel %vm1171_vm10, %v307_v12, -inf }
 0x151   : > { %v285_v17 = vcombine.low %v281_v13, %v282_v14  ;;  %v314_v24 = vcombine.low %v310_v15, %v311_v16  ;;  %v538_v16 = vld [vmem:[#allocation2 + $0xc] sm:$0xf] }
 0x152   : > { %v336_v21 = vpop.permute.xlu1 %335  ;;  %v365_v22 = vpop.permute.xlu0 %364 }
 0x153   : > { %v287_v23 = vmax.f32 %v1127_v33, %v285_v17  ;;  %v340_v25 = vsel %vm339_vm4, %v334_v61, %v336_v21  ;;  %v341_v26 = vsel %vm339_vm4, %v336_v21, %v1157_v41  ;;  %v369_v32 = vsel %vm1385_vm13, %v363_v60, %v365_v22 }
 0x154   : > { %v344_v27 = vsel %vm1187_vm11, %v340_v25, -inf  ;;  %v345_v28 = vsel %vm1191_vm12, %v341_v26, -inf  ;;  %v373_v36 = vsel %vm1203_vm14, %v369_v32, -inf }
 0x155   : > { %v316_v30 = vmax.f32 %v287_v23, %v314_v24  ;;  %v348_v31 = vcombine.low %v344_v27, %v345_v28 }
 0x156   : > { %v367_v34 = vpop.permute.xlu1 %366 }
 0x157   : > { %v370_v35 = vsel %vm1385_vm13, %v365_v22, %v367_v34  ;;  %v350_v39 = vmax.f32 %v316_v30, %v348_v31  ;;  %vm1410_vm13 = vcmask 785408  }
 0x158   : > { %v374_v37 = vsel %vm1208_vm15, %v370_v35, -inf }
 0x159   : > { %v377_v40 = vcombine.low %v373_v36, %v374_v37 }
 0x15a   : > { %v414_v45 = vpop.permute.xlu1 %413 }
 0x15b   : > { %v379_v41 = vmax.f32 %v350_v39, %v377_v40  ;;  %v416_v58 = vrot.slane %v414_v45, 4 }
 0x15d   : > { %755 = vst [vmem:[%s1139_s19 + $0x8] sm:$0xff] %v379_v41  ;;  %382 = vst [vmem:[#allocation2 + $0x4] sm:$0xff] %v379_v41 }
 0x164   : > { %v384_v42 = vld [vmem:[#allocation2 + $0x8] sm:$0xf]  ;;  %v383_v43 = vld [vmem:[#allocation2] sm:$0xff] }
 0x165   : > { %389 = vrot.lane.b32.xlu1 %v384_v42, %s960_s5  ;;  %387 = vrot.lane.b32.xlu0 %v383_v43, %s960_s5 }
 0x169   : > { %399 = vrot.lane.b32.xlu1 %v384_v42, %s959_s4  ;;  %397 = vrot.lane.b32.xlu0 %v383_v43, %s959_s4 }
 0x16d   : > { %411 = vrot.lane.b32.xlu0 %v379_v41, %s958_s30  ;;  %423 = vrot.lane.b32.xlu1 %v1150_v38, %s961_s21 }
 0x171   : > { %421 = vrot.lane.b32.xlu0 %v379_v41, %s961_s21 }
 0x175   : > { %480 = vrot.lane.b32.xlu0 %v472_v44, %s962_s6 }
 0x1d7   : > { %v390_v46 = vpop.permute.xlu1 %389  ;;  %v388_v47 = vpop.permute.xlu0 %387 }
 0x1d8   : > { %v392_v48 = vrot.slane %v390_v46, 4  ;;  %v391_v49 = vrot.slane %v388_v47, 4 }
 0x1da   : > { %v393_v52 = vsel %vm210_vm0, %v391_v49, %v392_v48 }
 0x1db   : > { %v400_v50 = vpop.permute.xlu1 %399  ;;  %v398_v51 = vpop.permute.xlu0 %397  ;;  %v394_v38 = vsel %vm212_vm1, %v388_v47, %v393_v52 }
 0x1dc   : > { %v402_v53 = vrot.slane %v400_v50, 4  ;;  %v401_v54 = vrot.slane %v398_v51, 4  ;;  %v396_v61 = vmax.f32 %v379_v41, %v394_v38 }
 0x1de   : > { %v403_v55 = vsel %vm210_vm0, %v401_v54, %v402_v53 }
 0x1df   : > { %v412_v56 = vpop.permute.xlu0 %411  ;;  %v424_v57 = vpop.permute.xlu1 %423  ;;  %v404_v60 = vsel %vm223_vm2, %v398_v51, %v403_v55 }
 0x1e0   : > { %v415_v59 = vrot.slane %v412_v56, 4  ;;  %v426_v63 = vrot.slane %v424_v57, 4  ;;  %v406_v6 = vmax.f32 %v396_v61, %v404_v60 }
 0x1e2   : > { %v417_v62 = vsel %vm210_vm0, %v415_v59, %v416_v58  ;;  %v602_v59 = vld [vmem:[#allocation2 + $0xc] sm:$0xf] }
 0x1e3   : > { %v418_v4 = vsel %vm238_vm3, %v412_v56, %v417_v62  ;;  %v422_v5 = vpop.permute.xlu0 %421 }
 0x1e4   : > { %v425_v7 = vrot.slane %v422_v5, 4  ;;  %v420_v8 = vmax.f32 %v406_v6, %v418_v4 }
 0x1e6   : > { %v427_v9 = vsel %vm210_vm0, %v425_v7, %v426_v63 }
 0x1e7   : > { %v428_v10 = vsel %vm1410_vm13, %v422_v5, %v427_v9  ;;  %v481_v17 = vpop.permute.xlu0 %480  ;;  %vm1411_vm13 = vcmask 1031168  }
 0x1e8   : > { %v430_v11 = vmax.f32 %v420_v8, %v428_v10 }
 0x1ea   : > { %431 = vst [vmem:[#allocation2 + $0x4] sm:$0xff] %v430_v11  ;;  %v475_v15 = vcombine.high %v430_v11, %v430_v11 }
 0x1f1   : > { %v432_v12 = vld [vmem:[#allocation2] sm:$0xff]  ;;  %v433_v13 = vld [vmem:[#allocation2 + $0x8] sm:$0xf] }
 0x1f2   : > { %454 = vrot.lane.b32.xlu1 %v432_v12, %s963_s8  ;;  %437 = vrot.lane.b32.xlu0 %v432_v12, %s964_s15  ;;  %v436_v14 = vcombine.high %v432_v12, %v432_v12 }
 0x1f6   : > { %458 = vrot.lane.b32.xlu1 %v433_v13, %s963_s8  ;;  %441 = vrot.lane.b32.xlu0 %v433_v13, %s964_s15 }
 0x1fa   : > { %493 = vrot.lane.b32.xlu1 %v430_v11, %s965_s18  ;;  %476 = vrot.lane.b32.xlu0 %v430_v11, %s962_s6 }
 0x1fe   : > { %456 = vrot.lane.b32.xlu0 %v436_v14, %s963_s8  ;;  %439 = vrot.lane.b32.xlu1 %v436_v14, %s964_s15 }
 0x202   : > { %495 = vrot.lane.b32.xlu0 %v475_v15, %s965_s18  ;;  %478 = vrot.lane.b32.xlu1 %v475_v15, %s962_s6 }
 0x206   : > { %497 = vrot.lane.b32.xlu1 %v472_v44, %s965_s18 }
 0x20a   : > { %543 = vrot.lane.b32.xlu1 %v538_v16, %s958_s30 }
 0x264   : > { %v455_v20 = vpop.permute.xlu1 %454  ;;  %v438_v21 = vpop.permute.xlu0 %437 }
 0x268   : > { %v459_v22 = vpop.permute.xlu1 %458  ;;  %v442_v23 = vpop.permute.xlu0 %441 }
 0x26c   : > { %v494_v24 = vpop.permute.xlu1 %493  ;;  %v477_v25 = vpop.permute.xlu0 %476 }
 0x270   : > { %v440_v26 = vpop.permute.xlu1 %439  ;;  %v457_v27 = vpop.permute.xlu0 %456 }
 0x271   : > { %v443_v28 = vsel %vm276_vm7, %v438_v21, %v440_v26  ;;  %v444_v30 = vsel %vm276_vm7, %v440_v26, %v442_v23  ;;  %v460_v31 = vsel %vm1386_vm8, %v455_v20, %v457_v27  ;;  %v461_v32 = vsel %vm1386_vm8, %v457_v27, %v459_v22  ;;  %vm1412_vm8 = vmmov %vm1411_vm13 }
 0x272   : > { %v447_v34 = vsel %vm1159_vm5, %v443_v28, -inf  ;;  %v448_v35 = vsel %vm1163_vm6, %v444_v30, -inf  ;;  %v464_v36 = vsel %vm1167_vm9, %v460_v31, -inf  ;;  %v465_v37 = vsel %vm1171_vm10, %v461_v32, -inf }
 0x273   : > { %v451_v39 = vcombine.low %v447_v34, %v448_v35  ;;  %v468_v43 = vcombine.low %v464_v36, %v465_v37 }
 0x274   : > { %v479_v40 = vpop.permute.xlu1 %478  ;;  %v496_v41 = vpop.permute.xlu0 %495 }
 0x275   : > { %v453_v42 = vmax.f32 %v430_v11, %v451_v39  ;;  %v482_v44 = vsel %vm339_vm4, %v477_v25, %v479_v40  ;;  %v483_v45 = vsel %vm339_vm4, %v479_v40, %v481_v17  ;;  %v499_v50 = vsel %vm1411_vm13, %v494_v24, %v496_v41 }
 0x276   : > { %v486_v46 = vsel %vm1187_vm11, %v482_v44, -inf  ;;  %v487_v47 = vsel %vm1191_vm12, %v483_v45, -inf  ;;  %v503_v53 = vsel %vm1203_vm14, %v499_v50, -inf }
 0x277   : > { %v470_v48 = vmax.f32 %v453_v42, %v468_v43  ;;  %v490_v49 = vcombine.low %v486_v46, %v487_v47 }
 0x278   : > { %v498_v51 = vpop.permute.xlu1 %497 }
 0x279   : > { %v500_v52 = vsel %vm1412_vm8, %v496_v41, %v498_v51  ;;  %v492_v55 = vmax.f32 %v470_v48, %v490_v49  ;;  %vm1413_vm8 = vcmask 785408  }
 0x27a   : > { %v504_v54 = vsel %vm1208_vm15, %v500_v52, -inf }
 0x27b   : > { %v507_v38 = vcombine.low %v503_v53, %v504_v54 }
 0x27c   : > { %v544_v60 = vpop.permute.xlu1 %543 }
 0x27d   : > { %v509_v56 = vmax.f32 %v492_v55, %v507_v38  ;;  %v546_v14 = vrot.slane %v544_v60, 4 }
 0x27f   : > { %756 = vst [vmem:[%s1139_s19 + $0x10] sm:$0xff] %v509_v56  ;;  %512 = vst [vmem:[#allocation2 + $0x4] sm:$0xff] %v509_v56 }
 0x286   : > { %v514_v57 = vld [vmem:[#allocation2 + $0x8] sm:$0xf]  ;;  %v513_v58 = vld [vmem:[#allocation2] sm:$0xff] }
 0x287   : > { %519 = vrot.lane.b32.xlu1 %v514_v57, %s960_s5  ;;  %517 = vrot.lane.b32.xlu0 %v513_v58, %s960_s5 }
 0x28b   : > { %529 = vrot.lane.b32.xlu1 %v514_v57, %s959_s4  ;;  %527 = vrot.lane.b32.xlu0 %v513_v58, %s959_s4  ;;  %s967_s4 = smov [#allocation6]  }
 0x28c   : > { %s876_s5 = sshll.u32 %s967_s4, 4  ;;  %s877_s5 = int_to_ptr.vmem [resolvable:$false] %s876_s5 }
 0x28d   : > { %p879_p7 = scmp.lt.s32.totalorder %s1325_s26, %s877_s5 }
 0x28f   : > { %541 = vrot.lane.b32.xlu0 %v509_v56, %s958_s30  ;;  %553 = vrot.lane.b32.xlu1 %v538_v16, %s961_s21  ;;  %s872_s30 = scalar_lea.vmem %s1325_s26, 512 }
 0x290   : > { %p873_p8 = scmp.ne.s32.totalorder %s1325_s26, %s872_s30 }
 0x292   : > { %p874_p11 = pnand %p873_p8, %p1418_p9 }
 0x293   : > { %551 = vrot.lane.b32.xlu0 %v509_v56, %s961_s21  ;;  %s878_s21 = scalar_lea.vmem %s877_s5, 1024 }
 0x294   : > { %p875_p0 = pneg %p874_p11  ;;  %p880_p13 = scmp.lt.s32.totalorder %s878_s21, %s872_s30 }
 0x296   : > { %p881_p3 = por %p880_p13, %p879_p7 }
 0x297   : > { %610 = vrot.lane.b32.xlu0 %v602_v59, %s962_s6 }
 0x298   : > { %p882_p6 = pnand %p881_p3, %p875_p0 }
 0x2f9   : > { %v520_v61 = vpop.permute.xlu1 %519  ;;  %v518_v62 = vpop.permute.xlu0 %517 }
 0x2fa   : > { %v522_v63 = vrot.slane %v520_v61, 4  ;;  %v521_v4 = vrot.slane %v518_v62, 4 }
 0x2fc   : > { %v523_v7 = vsel %vm210_vm0, %v521_v4, %v522_v63 }
 0x2fd   : > { %v530_v5 = vpop.permute.xlu1 %529  ;;  %v528_v6 = vpop.permute.xlu0 %527  ;;  %v524_v11 = vsel %vm212_vm1, %v518_v62, %v523_v7 }
 0x2fe   : > { %v532_v8 = vrot.slane %v530_v5, 4  ;;  %v531_v9 = vrot.slane %v528_v6, 4  ;;  %v526_v17 = vmax.f32 %v509_v56, %v524_v11 }
 0x300   : > { %v533_v10 = vsel %vm210_vm0, %v531_v9, %v532_v8 }
 0x301   : > { %v542_v12 = vpop.permute.xlu0 %541  ;;  %v554_v13 = vpop.permute.xlu1 %553  ;;  %v534_v16 = vsel %vm223_vm2, %v528_v6, %v533_v10  ;;  %vm1416_vm2 = vmmov %vm1411_vm13 }
 0x302   : > { %v545_v15 = vrot.slane %v542_v12, 4  ;;  %v556_v21 = vrot.slane %v554_v13, 4  ;;  %v536_v24 = vmax.f32 %v526_v17, %v534_v16 }
 0x304   : > { %v547_v20 = vsel %vm210_vm0, %v545_v15, %v546_v14 }
 0x305   : > { %v548_v22 = vsel %vm238_vm3, %v542_v12, %v547_v20  ;;  %v552_v23 = vpop.permute.xlu0 %551  ;;  %vm1417_vm3 = vmmov %vm1416_vm2 }
 0x306   : > { %v555_v25 = vrot.slane %v552_v23, 4  ;;  %v550_v26 = vmax.f32 %v536_v24, %v548_v22 }
 0x308   : > { %v557_v27 = vsel %vm210_vm0, %v555_v25, %v556_v21  ;;  %vm1414_vm0 = vcmask 7168  }
 0x309   : > { %v558_v28 = vsel %vm1413_vm8, %v552_v23, %v557_v27  ;;  %v611_v36 = vpop.permute.xlu0 %610  ;;  %vm1415_vm1 = vmmov %vm1414_vm0 }
 0x30a   : > { %v560_v30 = vmax.f32 %v550_v26, %v558_v28 }
 0x30c   : > { %561 = vst [vmem:[#allocation2 + $0x4] sm:$0xff] %v560_v30  ;;  %v605_v35 = vcombine.high %v560_v30, %v560_v30 }
 0x313   : > { %v562_v31 = vld [vmem:[#allocation2] sm:$0xff]  ;;  %v563_v32 = vld [vmem:[#allocation2 + $0x8] sm:$0xf] }
 0x314   : > { %584 = vrot.lane.b32.xlu1 %v562_v31, %s963_s8  ;;  %567 = vrot.lane.b32.xlu0 %v562_v31, %s964_s15  ;;  %v566_v34 = vcombine.high %v562_v31, %v562_v31 }
 0x318   : > { %588 = vrot.lane.b32.xlu1 %v563_v32, %s963_s8  ;;  %571 = vrot.lane.b32.xlu0 %v563_v32, %s964_s15 }
 0x31c   : > { %623 = vrot.lane.b32.xlu1 %v560_v30, %s965_s18  ;;  %606 = vrot.lane.b32.xlu0 %v560_v30, %s962_s6 }
 0x320   : > { %586 = vrot.lane.b32.xlu0 %v566_v34, %s963_s8  ;;  %569 = vrot.lane.b32.xlu1 %v566_v34, %s964_s15 }
 0x324   : > { %625 = vrot.lane.b32.xlu0 %v605_v35, %s965_s18  ;;  %608 = vrot.lane.b32.xlu1 %v605_v35, %s962_s6 }
 0x328   : > { %627 = vrot.lane.b32.xlu1 %v602_v59, %s965_s18 }
 0x386   : > { %v585_v37 = vpop.permute.xlu1 %584  ;;  %v568_v39 = vpop.permute.xlu0 %567 }
 0x38a   : > { %v589_v40 = vpop.permute.xlu1 %588  ;;  %v572_v41 = vpop.permute.xlu0 %571 }
 0x38e   : > { %v624_v42 = vpop.permute.xlu1 %623  ;;  %v607_v43 = vpop.permute.xlu0 %606 }
 0x392   : > { %v570_v44 = vpop.permute.xlu1 %569  ;;  %v587_v45 = vpop.permute.xlu0 %586 }
 0x393   : > { %v573_v46 = vsel %vm276_vm7, %v568_v39, %v570_v44  ;;  %v574_v47 = vsel %vm276_vm7, %v570_v44, %v572_v41  ;;  %v590_v48 = vsel %vm1414_vm0, %v585_v37, %v587_v45  ;;  %v591_v49 = vsel %vm1415_vm1, %v587_v45, %v589_v40 }
 0x394   : > { %v577_v50 = vsel %vm1159_vm5, %v573_v46, -inf  ;;  %v578_v51 = vsel %vm1163_vm6, %v574_v47, -inf  ;;  %v594_v52 = vsel %vm1167_vm9, %v590_v48, -inf  ;;  %v595_v53 = vsel %vm1171_vm10, %v591_v49, -inf }
 0x395   : > { %v581_v54 = vcombine.low %v577_v50, %v578_v51  ;;  %v598_v57 = vcombine.low %v594_v52, %v595_v53 }
 0x396   : > { %v609_v55 = vpop.permute.xlu1 %608  ;;  %v626_v38 = vpop.permute.xlu0 %625 }
 0x397   : > { %v583_v56 = vmax.f32 %v560_v30, %v581_v54  ;;  %v612_v58 = vsel %vm339_vm4, %v607_v43, %v609_v55  ;;  %v613_v0 = vsel %vm339_vm4, %v609_v55, %v611_v36  ;;  %v629_v60 = vsel %vm1416_vm2, %v624_v42, %v626_v38 }
 0x398   : > { %v616_v1 = vsel %vm1187_vm11, %v612_v58, -inf  ;;  %v617_v2 = vsel %vm1191_vm12, %v613_v0, -inf  ;;  %v633_v63 = vsel %vm1203_vm14, %v629_v60, -inf }
 0x399   : > { %v600_v3 = vmax.f32 %v583_v56, %v598_v57  ;;  %v620_v59 = vcombine.low %v616_v1, %v617_v2 }
 0x39a   : > { %v628_v61 = vpop.permute.xlu1 %627 }
 0x39b   : > { %v630_v62 = vsel %vm1417_vm3, %v626_v38, %v628_v61  ;;  %v622_v19 = vmax.f32 %v600_v3, %v620_v59 }
 0x39c   : > { %v634_v18 = vsel %vm1208_vm15, %v630_v62, -inf }
 0x39d   : > { %v637_v4 = vcombine.low %v633_v63, %v634_v18 }
 0x39f   : > { %v639_v5 = vmax.f32 %v622_v19, %v637_v4 }
 0x3a1   : > { %757 = vst [vmem:[%s1139_s19 + $0x18] sm:$0xff] %v639_v5 }
 0x3a2   : > { %885 = shalt.err (!%p882_p6)
}
 0x3a3   : > { %s886_s6 = scalar_lea.hbm %s1330_s7, 512  ;;  %s890_s16 = scalar_lea.hbm %s1382_s2, 1024 }
 0x3a4   : > { %p887_p4 = scmp.ne.s32.totalorder %s1330_s7, %s886_s6  ;;  %p891_p1 = scmp.lt.u32.totalorder %s1330_s7, %s1382_s2 }
 0x3a5   : > { %p892_p2 = scmp.lt.u32.totalorder %s890_s16, %s886_s6  ;;  %p894_p8 = scmp.lt.u32.totalorder %s886_s6, %s1330_s7 }
 0x3a6   : > { %p888_p10 = pnand %p887_p4, %p1418_p9 }
 0x3a7   : > { %p893_p5 = por %p892_p2, %p891_p1 }
 0x3a8   : > { %p889_p12 = pneg %p888_p10 }
 0x3a9   : > { %p895_p11 = por %p894_p8, %p893_p5 }
 0x3ab   : > { %p896_p0 = pnand %p895_p11, %p889_p12 }
 0x3ad   : > { %899 = shalt.err (!%p896_p0)
}
 0x3ae   : > { %s968_s20 = smov 128   ;;  %s969_s25 = smov 8  }
 0x3af   : > { %767 = dma.vmem_to_hbm [thread:$0]  (%p1418_p9), %s1325_s26, 512, %s1330_s7, %s643_s12, %s968_s20, %s968_s20, %s969_s25  }
 0x3b0 PF: > { %s673_s27 = sand.u32 1, %s934_s9   ;;  %p1419_p7 = scmp.ne.s32.totalorder %s1390_s24, 0 }
 0x3b1   : > { %p1420_p13 = scmp.ge.s32.totalorder %s954_s14, 2  ;;  %s674_s29 = scalar_lea.sflag [#allocation5], %s673_s27 }
 0x3b3   : > { %p774_p3 = pnand %p1420_p13, %p1419_p7 }
 0x3b5   : > { %929 = dma.done.wait (!%p774_p3), %s674_s29, 512  }
 0x3b6   : > { %931 = vsyncadd (!%p774_p3), %s674_s29, 4294966784  ;;  %s18_s14 = sadd.s32 1, %s954_s14   ;;  %s1421_s9 = smov %s938_s10 }
 0x3b7   : > { %p15_p6 = scmp.ge.s32.totalorder %s18_s14, 4   ;;  %s1422_s10 = smov %s942_s11 }
 0x3b8   : > { %s1423_s11 = smov %s1041_s23  ;;  %s1424_s12 = smov %s950_s13 }
 0x3b9   : > { %s1425_s13 = smov %s1427_s17  ;;  %17 = sbr.rel (!%p15_p6) target bundleno = 6 (0x6), region = 76 }
 0x3c0   :  { %679 = vsyncpa [#allocation4], 1 }
 0x3c1   :  { %681 = vsyncpa [#allocation4 + $0x1], 1 }
 0x3c2   :  { %682 = vsyncpa [#allocation5], 1 }
 0x3c3   :  { %684 = vsyncpa [#allocation5 + $0x1], 1 }

</bundles_post_ra>
